<compile_context>
chip_gen: v7x
topology: tpu7x:2x2x1
jax: 0.10.0
libtpu: 0.0.40
codegen_flags: <defaults>
</compile_context>

<pallas_src>
import jax
import jax.numpy as jnp
import numpy as np
from jax.experimental import pallas as pl
from jax.experimental.pallas import tpu as pltpu  # noqa: F401  (kept for interpret-mode debugging)

MID_DIM = 32  # RadialProfile hidden width: Linear(4,32) -> ReLU -> Linear(32,32) -> ReLU -> Linear(32,6)


# ----------------------------------------------------------------------------- kernel
def _xattention_kernel(x0_ref, x2_ref, w_ref, ring_ref, o_ref):
    """One invocation over the whole batch (no grid). Lane-dense layout: nodes on lanes.

    x0_ref  : (B, 3, N) node features == coordinates (input channel 0), transposed
    x2_ref  : (B, 3, N) invariant edge features (input channel 2), transposed
    w_ref   : (35, 38) packed weights (layout documented in _pack_weights)
    ring_ref: (N, 2N)  ring-graph shift matrices [M_next | M_prev]
    o_ref   : (B, 3, N) projected output channel 0, node-indexed, transposed
    """
    B = x0_ref.shape[0]
    N = x0_ref.shape[2]

    # ---- packed weights (sliced once, loop-invariant) --------------------------------
    w = w_ref[...]
    w2 = w[0:32, 0:32]      # (32, 32) RadialProfile hidden layer
    w1e = w[0:32, 32:35]    # (32, 3)  RadialProfile layer 1, edge-feature columns
    w1d = w[0:32, 35:36]    # (32, 1)  RadialProfile layer 1, edge-length column
    b1 = w[0:32, 36:37]     # (32, 1)
    b2 = w[0:32, 37:38]     # (32, 1)
    w3v = w[32:35, 0:32]    # (3, 32)  RadialProfile layer 3, value rows of w3 (key rows are dead)
    wpz = w[32:35, 32:33]   # (3, 1)   project column acting on z
    wpx = w[32:35, 33:36]   # (3, 3)   project columns acting on node features

    ring = ring_ref[...]
    m_next = ring[:, 0:N]   # y @ m_next : y[:, e] -> y[:, (e+1) % N]   (gather at dst)
    m_prev = ring[:, N:]    # y @ m_prev : y[:, n] -> y[:, (n-1) % N]   (scatter to dst)
    # TODO(synk): for large N, replace the N x N permutation matmuls with pltpu.roll (XLU).

    # B is tiny & static: unrolled Python loop, no per-step pipeline or DMA overhead.
    # TODO(synk): for large B, fold the batch into the lane axis or grid over it with
    #             dimension_semantics=("parallel",) to exploit v7x's two TensorCores.
    for b in range(B):
        x0 = x0_ref[b]          # (3, N)  node features at src(e) == e
        x2 = x2_ref[b]          # (3, N)

        # node features at dst(e) = (e+1) % N, and the edge-length invariant
        x0d = jnp.dot(x0, m_next, preferred_element_type=jnp.float32)          # (3, N)
        d = x0d - x0
        dist = jnp.sqrt(d[0:1] * d[0:1] + d[1:2] * d[1:2] + d[2:3] * d[2:3])   # (1, N)

        # RadialProfile MLP. K=3 / K=1 contractions stay on the VPU as broadcast
        # mul-adds; only the 32x32 hidden layer goes to the MXU.
        h = (w1e[:, 0:1] * x2[0:1] + w1e[:, 1:2] * x2[1:2] + w1e[:, 2:3] * x2[2:3]
             + w1d * dist + b1)                                                 # (32, N)
        h = jnp.maximum(h, 0.0)
        h = jnp.dot(w2, h, preferred_element_type=jnp.float32) + b2             # (32, N)
        h = jnp.maximum(h, 0.0)
        vw = jnp.dot(w3v, h, preferred_element_type=jnp.float32)                # (3, N)

        # per-edge value = <radial value weights, node_feat[src(e)]>
        value = vw[0:1] * x0[0:1] + vw[1:2] * x0[1:2] + vw[2:3] * x0[2:3]       # (1, N)

        # Attention path elided: the ring graph has in-degree exactly 1, so the per-node
        # edge_softmax is identically 1 and z[dst(e)] == value[e] (bit-identical to the
        # reference, which hard-codes attn = ones). key/query/logits/exp are dead code.
        zc = jnp.dot(wpz * value, m_prev, preferred_element_type=jnp.float32)   # (3, N)

        # project(LinearSE3): out0[:, n] = Wp @ cat([z[n], x0[n]])
        out = (zc + wpx[:, 0:1] * x0[0:1] + wpx[:, 1:2] * x0[1:2]
               + wpx[:, 2:3] * x0[2:3])                                         # (3, N)
        o_ref[b] = out.astype(o_ref.dtype)


# ----------------------------------------------------------------------------- wrapper
def _pack_weights(params):
    """Single packed (35, 38) f32 weight operand.

    rows 0:32 : cols 0:32 = W2, cols 32:35 = W1[:, :3], col 35 = W1[:, 3],
                col 36 = b1, col 37 = b2
    rows 32:35: cols 0:32 = W3[value rows], col 32 = Wp[:, 0], cols 33:36 = Wp[:, 1:4]
    """
    w = jnp.zeros((35, 38), jnp.float32)
    w = w.at[0:32, 0:32].set(params["w2"])
    w = w.at[0:32, 32:35].set(params["w1"][:, 0:3])
    w = w.at[0:32, 35].set(params["w1"][:, 3])
    w = w.at[0:32, 36].set(params["b1"])
    w = w.at[0:32, 37].set(params["b2"])
    w = w.at[32:35, 0:32].set(params["w3"][0:3, :])
    w = w.at[32:35, 32].set(params["wp"][:, 0])
    w = w.at[32:35, 33:36].set(params["wp"][:, 1:4])
    return w


@jax.jit
def xattention_forward(x, params):
    B, C, N, W = x.shape
    assert C == 3 and W == 3, "Input shape should be (B, 3, num_nodes, 3)"

    x0 = x[:, 0]                    # node features / coordinates  (B, N, 3)
    x1 = x[:, 1]                    # passthrough channel
    x2 = x[:, 2]                    # edge features                (B, N, 3)

    # lane-dense layout: node/edge axis last (lanes), xyz channels on sublanes
    x0t = jnp.transpose(x0, (0, 2, 1)).astype(jnp.float32)      # (B, 3, N)
    x2t = jnp.transpose(x2, (0, 2, 1)).astype(jnp.float32)      # (B, 3, N)

    wpk = _pack_weights(params)                                 # (35, 38)
    eye = jnp.eye(N, dtype=jnp.float32)
    m_next = jnp.roll(eye, 1, axis=0)                           # gather-at-dst permutation
    ring = jnp.concatenate([m_next, m_next.T], axis=1)          # (N, 2N): [M_next | M_prev]

    # No grid: the whole (tiny) problem is a single kernel step; every operand
    # (< 64 KiB total) lives fully in VMEM, so there is no per-step pipeline overhead
    # and only 5 DMA streams total.
    out0t = pl.pallas_call(
        _xattention_kernel,
        out_shape=jax.ShapeDtypeStruct((B, 3, N), jnp.float32),
    )(x0t, x2t, wpk, ring)

    out0 = jnp.transpose(out0t, (0, 2, 1)).astype(x.dtype)
    return jnp.stack([out0, x1, x2], axis=1)


# ----------------------------------------------------------------------------- params
def init_params(key, node_channels=3, edge_channels=3, channels_div=2):
    c_val = node_channels // channels_div          # value fiber channels      = 1
    c_kq = c_val                                   # key/query fiber channels  = 1
    c_kv = c_val + c_kq                            # to_key_value out channels = 2
    edge_dim = edge_channels + 1                   # RadialProfile edge_dim    = 4
    ks = jax.random.split(key, 7)

    def w(k, shape, fan_in):
        return jax.random.normal(k, shape, jnp.float32) / np.sqrt(fan_in)

    return dict(
        # RadialProfile of to_key_value ConvSE3 conv['0,0']
        w1=w(ks[0], (MID_DIM, edge_dim), edge_dim),
        b1=0.1 * jax.random.normal(ks[1], (MID_DIM,), jnp.float32),
        w2=w(ks[2], (MID_DIM, MID_DIM), MID_DIM),
        b2=0.1 * jax.random.normal(ks[3], (MID_DIM,), jnp.float32),
        w3=w(ks[4], (c_kv * node_channels, MID_DIM), MID_DIM),        # (6, 32), no bias
        # LinearSE3 to_query / project (wq feeds the dead attention path; kept for the reference)
        wq=w(ks[5], (c_kq, node_channels), node_channels),            # (1, 3)
        wp=w(ks[6], (node_channels, c_val + node_channels),
             c_val + node_channels),                                  # (3, 4)
    )


# ----------------------------------------------------------------------------- pure-JAX reference
def xattention_reference(x, params):
    B, C, N, _ = x.shape
    src = jnp.arange(N)
    dst = (src + 1) % N

    def per_batch(xb):
        x0, x1, x2 = xb[0], xb[1], xb[2]
        diff = x0[dst] - x0[src]
        dist = jnp.linalg.norm(diff, axis=-1, keepdims=True)
        edge_inv = jnp.concatenate([x2, dist], axis=-1)                       # (E, 4)
        h = jax.nn.relu(edge_inv @ params["w1"].T + params["b1"])
        h = jax.nn.relu(h @ params["w2"].T + params["b2"])
        radial = (h @ params["w3"].T).reshape(N, 2, 3)                        # (E, c_out, c_in)
        kv = jnp.matmul(radial, x0[src][:, :, None])                          # (E, 2, 1)
        value, key = kv[:, 0], kv[:, 1]                                       # (E, 1)
        query = jnp.matmul(params["wq"], x0[:, :, None])[:, :, 0]             # (N, 1)
        logits = jnp.sum(key * query[dst], axis=-1) / np.sqrt(1.0)            # (E,)
        attn = jnp.ones_like(logits)                                          # edge_softmax, in-degree 1
        z = jnp.zeros((N, 1), jnp.float32).at[dst].add(attn[:, None] * value)
        zc = jnp.concatenate([z, x0], axis=-1)                                # (N, 4)
        out0 = jnp.matmul(params["wp"], zc[:, :, None])[:, :, 0]              # (N, 3)
        return jnp.stack([out0, x1, x2], axis=0)

    return jax.vmap(per_batch)(x)


# ----------------------------------------------------------------------------- main
if __name__ == "__main__":
    B, num_nodes = 2, 16
    key = jax.random.PRNGKey(0)
    k_x, k_p = jax.random.split(key)

    x = jax.random.normal(k_x, (B, 3, num_nodes, 3), jnp.float32)
    params = init_params(k_p)

    out = xattention_forward(x, params)
    out = jax.block_until_ready(out)
    assert out.shape == x.shape and out.dtype == x.dtype

    ref = xattention_reference(x, params)
    np.testing.assert_allclose(np.asarray(out), np.asarray(ref), rtol=1e-2, atol=1e-2)

    print("KERNEL_OK")
</pallas_src>

<mosaic_0001>
module attributes {stable_mosaic.version = 11 : i64} {
  func.func @_xattention_kernel(%arg0: memref<2x3x16xf32, #tpu.memory_space<vmem>>, %arg1: memref<2x3x16xf32, #tpu.memory_space<vmem>>, %arg2: memref<35x38xf32, #tpu.memory_space<vmem>>, %arg3: memref<16x32xf32, #tpu.memory_space<vmem>>, %arg4: memref<2x3x16xf32, #tpu.memory_space<vmem>>) attributes {dimension_semantics = [], scalar_prefetch = 0 : i64, scratch_operands = 0 : i64, tpu.core_type = #tpu.core_type<tc>} {
    %c0 = arith.constant 0 : index
    %c0_0 = arith.constant 0 : index
    %0 = vector.load %arg2[%c0, %c0_0] : memref<35x38xf32, #tpu.memory_space<vmem>>, vector<35x38xf32>
    %1 = vector.extract_strided_slice %0 {offsets = [0, 0], sizes = [32, 32], strides = [1, 1]} : vector<35x38xf32> to vector<32x32xf32>
    %2 = vector.extract_strided_slice %0 {offsets = [0, 32], sizes = [32, 3], strides = [1, 1]} : vector<35x38xf32> to vector<32x3xf32>
    %3 = vector.extract_strided_slice %0 {offsets = [0, 35], sizes = [32, 1], strides = [1, 1]} : vector<35x38xf32> to vector<32x1xf32>
    %4 = vector.extract_strided_slice %0 {offsets = [0, 36], sizes = [32, 1], strides = [1, 1]} : vector<35x38xf32> to vector<32x1xf32>
    %5 = vector.extract_strided_slice %0 {offsets = [0, 37], sizes = [32, 1], strides = [1, 1]} : vector<35x38xf32> to vector<32x1xf32>
    %6 = vector.extract_strided_slice %0 {offsets = [32, 0], sizes = [3, 32], strides = [1, 1]} : vector<35x38xf32> to vector<3x32xf32>
    %7 = vector.extract_strided_slice %0 {offsets = [32, 32], sizes = [3, 1], strides = [1, 1]} : vector<35x38xf32> to vector<3x1xf32>
    %8 = vector.extract_strided_slice %0 {offsets = [32, 33], sizes = [3, 3], strides = [1, 1]} : vector<35x38xf32> to vector<3x3xf32>
    %c0_1 = arith.constant 0 : index
    %c0_2 = arith.constant 0 : index
    %9 = vector.load %arg3[%c0_1, %c0_2] : memref<16x32xf32, #tpu.memory_space<vmem>>, vector<16x32xf32>
    %10 = vector.extract_strided_slice %9 {offsets = [0, 0], sizes = [16, 16], strides = [1, 1]} : vector<16x32xf32> to vector<16x16xf32>
    %11 = vector.extract_strided_slice %9 {offsets = [0, 16], sizes = [16, 16], strides = [1, 1]} : vector<16x32xf32> to vector<16x16xf32>
    %c0_3 = arith.constant 0 : index
    %c0_4 = arith.constant 0 : index
    %c0_5 = arith.constant 0 : index
    %12 = vector.load %arg0[%c0_3, %c0_4, %c0_5] : memref<2x3x16xf32, #tpu.memory_space<vmem>>, vector<1x3x16xf32>
    %13 = vector.shape_cast %12 : vector<1x3x16xf32> to vector<3x16xf32>
    %c0_6 = arith.constant 0 : index
    %c0_7 = arith.constant 0 : index
    %c0_8 = arith.constant 0 : index
    %14 = vector.load %arg1[%c0_6, %c0_7, %c0_8] : memref<2x3x16xf32, #tpu.memory_space<vmem>>, vector<1x3x16xf32>
    %15 = vector.shape_cast %14 : vector<1x3x16xf32> to vector<3x16xf32>
    %cst = arith.constant dense<0.000000e+00> : vector<3x16xf32>
    %16 = tpu.matmul %13, %10, %cst {dimension_numbers = #tpu.dot_dimension_numbers<[1], [0], [0], [1], [0, 0, 1, 1], [], []>} : vector<3x16xf32>, vector<16x16xf32>, vector<3x16xf32> -> vector<3x16xf32>
    %17 = arith.subf %16, %13 : vector<3x16xf32>
    %18 = vector.extract_strided_slice %17 {offsets = [0, 0], sizes = [1, 16], strides = [1, 1]} : vector<3x16xf32> to vector<1x16xf32>
    %19 = vector.extract_strided_slice %17 {offsets = [0, 0], sizes = [1, 16], strides = [1, 1]} : vector<3x16xf32> to vector<1x16xf32>
    %20 = arith.mulf %18, %19 : vector<1x16xf32>
    %21 = vector.extract_strided_slice %17 {offsets = [1, 0], sizes = [1, 16], strides = [1, 1]} : vector<3x16xf32> to vector<1x16xf32>
    %22 = vector.extract_strided_slice %17 {offsets = [1, 0], sizes = [1, 16], strides = [1, 1]} : vector<3x16xf32> to vector<1x16xf32>
    %23 = arith.mulf %21, %22 : vector<1x16xf32>
    %24 = arith.addf %20, %23 : vector<1x16xf32>
    %25 = vector.extract_strided_slice %17 {offsets = [2, 0], sizes = [1, 16], strides = [1, 1]} : vector<3x16xf32> to vector<1x16xf32>
    %26 = vector.extract_strided_slice %17 {offsets = [2, 0], sizes = [1, 16], strides = [1, 1]} : vector<3x16xf32> to vector<1x16xf32>
    %27 = arith.mulf %25, %26 : vector<1x16xf32>
    %28 = arith.addf %24, %27 : vector<1x16xf32>
    %29 = math.sqrt %28 : vector<1x16xf32>
    %30 = vector.extract_strided_slice %2 {offsets = [0, 0], sizes = [32, 1], strides = [1, 1]} : vector<32x3xf32> to vector<32x1xf32>
    %31 = vector.extract_strided_slice %15 {offsets = [0, 0], sizes = [1, 16], strides = [1, 1]} : vector<3x16xf32> to vector<1x16xf32>
    %32 = vector.broadcast %30 : vector<32x1xf32> to vector<32x16xf32>
    %33 = vector.broadcast %31 : vector<1x16xf32> to vector<32x16xf32>
    %34 = arith.mulf %32, %33 : vector<32x16xf32>
    %35 = vector.extract_strided_slice %2 {offsets = [0, 1], sizes = [32, 1], strides = [1, 1]} : vector<32x3xf32> to vector<32x1xf32>
    %36 = vector.extract_strided_slice %15 {offsets = [1, 0], sizes = [1, 16], strides = [1, 1]} : vector<3x16xf32> to vector<1x16xf32>
    %37 = vector.broadcast %35 : vector<32x1xf32> to vector<32x16xf32>
    %38 = vector.broadcast %36 : vector<1x16xf32> to vector<32x16xf32>
    %39 = arith.mulf %37, %38 : vector<32x16xf32>
    %40 = arith.addf %34, %39 : vector<32x16xf32>
    %41 = vector.extract_strided_slice %2 {offsets = [0, 2], sizes = [32, 1], strides = [1, 1]} : vector<32x3xf32> to vector<32x1xf32>
    %42 = vector.extract_strided_slice %15 {offsets = [2, 0], sizes = [1, 16], strides = [1, 1]} : vector<3x16xf32> to vector<1x16xf32>
    %43 = vector.broadcast %41 : vector<32x1xf32> to vector<32x16xf32>
    %44 = vector.broadcast %42 : vector<1x16xf32> to vector<32x16xf32>
    %45 = arith.mulf %43, %44 : vector<32x16xf32>
    %46 = arith.addf %40, %45 : vector<32x16xf32>
    %47 = vector.broadcast %3 : vector<32x1xf32> to vector<32x16xf32>
    %48 = vector.broadcast %29 : vector<1x16xf32> to vector<32x16xf32>
    %49 = arith.mulf %47, %48 : vector<32x16xf32>
    %50 = arith.addf %46, %49 : vector<32x16xf32>
    %51 = vector.broadcast %4 : vector<32x1xf32> to vector<32x16xf32>
    %52 = arith.addf %50, %51 : vector<32x16xf32>
    %cst_9 = arith.constant 0.000000e+00 : f32
    %53 = vector.broadcast %cst_9 : f32 to vector<32x16xf32>
    %54 = arith.maximumf %52, %53 : vector<32x16xf32>
    %cst_10 = arith.constant dense<0.000000e+00> : vector<32x16xf32>
    %55 = tpu.matmul %1, %54, %cst_10 {dimension_numbers = #tpu.dot_dimension_numbers<[1], [0], [0], [1], [0, 0, 1, 1], [], []>} : vector<32x32xf32>, vector<32x16xf32>, vector<32x16xf32> -> vector<32x16xf32>
    %56 = vector.broadcast %5 : vector<32x1xf32> to vector<32x16xf32>
    %57 = arith.addf %55, %56 : vector<32x16xf32>
    %cst_11 = arith.constant 0.000000e+00 : f32
    %58 = vector.broadcast %cst_11 : f32 to vector<32x16xf32>
    %59 = arith.maximumf %57, %58 : vector<32x16xf32>
    %cst_12 = arith.constant dense<0.000000e+00> : vector<3x16xf32>
    %60 = tpu.matmul %6, %59, %cst_12 {dimension_numbers = #tpu.dot_dimension_numbers<[1], [0], [0], [1], [0, 0, 1, 1], [], []>} : vector<3x32xf32>, vector<32x16xf32>, vector<3x16xf32> -> vector<3x16xf32>
    %61 = vector.extract_strided_slice %60 {offsets = [0, 0], sizes = [1, 16], strides = [1, 1]} : vector<3x16xf32> to vector<1x16xf32>
    %62 = vector.extract_strided_slice %13 {offsets = [0, 0], sizes = [1, 16], strides = [1, 1]} : vector<3x16xf32> to vector<1x16xf32>
    %63 = arith.mulf %61, %62 : vector<1x16xf32>
    %64 = vector.extract_strided_slice %60 {offsets = [1, 0], sizes = [1, 16], strides = [1, 1]} : vector<3x16xf32> to vector<1x16xf32>
    %65 = vector.extract_strided_slice %13 {offsets = [1, 0], sizes = [1, 16], strides = [1, 1]} : vector<3x16xf32> to vector<1x16xf32>
    %66 = arith.mulf %64, %65 : vector<1x16xf32>
    %67 = arith.addf %63, %66 : vector<1x16xf32>
    %68 = vector.extract_strided_slice %60 {offsets = [2, 0], sizes = [1, 16], strides = [1, 1]} : vector<3x16xf32> to vector<1x16xf32>
    %69 = vector.extract_strided_slice %13 {offsets = [2, 0], sizes = [1, 16], strides = [1, 1]} : vector<3x16xf32> to vector<1x16xf32>
    %70 = arith.mulf %68, %69 : vector<1x16xf32>
    %71 = arith.addf %67, %70 : vector<1x16xf32>
    %72 = vector.broadcast %7 : vector<3x1xf32> to vector<3x16xf32>
    %73 = vector.broadcast %71 : vector<1x16xf32> to vector<3x16xf32>
    %74 = arith.mulf %72, %73 : vector<3x16xf32>
    %cst_13 = arith.constant dense<0.000000e+00> : vector<3x16xf32>
    %75 = tpu.matmul %74, %11, %cst_13 {dimension_numbers = #tpu.dot_dimension_numbers<[1], [0], [0], [1], [0, 0, 1, 1], [], []>} : vector<3x16xf32>, vector<16x16xf32>, vector<3x16xf32> -> vector<3x16xf32>
    %76 = vector.extract_strided_slice %8 {offsets = [0, 0], sizes = [3, 1], strides = [1, 1]} : vector<3x3xf32> to vector<3x1xf32>
    %77 = vector.extract_strided_slice %13 {offsets = [0, 0], sizes = [1, 16], strides = [1, 1]} : vector<3x16xf32> to vector<1x16xf32>
    %78 = vector.broadcast %76 : vector<3x1xf32> to vector<3x16xf32>
    %79 = vector.broadcast %77 : vector<1x16xf32> to vector<3x16xf32>
    %80 = arith.mulf %78, %79 : vector<3x16xf32>
    %81 = arith.addf %75, %80 : vector<3x16xf32>
    %82 = vector.extract_strided_slice %8 {offsets = [0, 1], sizes = [3, 1], strides = [1, 1]} : vector<3x3xf32> to vector<3x1xf32>
    %83 = vector.extract_strided_slice %13 {offsets = [1, 0], sizes = [1, 16], strides = [1, 1]} : vector<3x16xf32> to vector<1x16xf32>
    %84 = vector.broadcast %82 : vector<3x1xf32> to vector<3x16xf32>
    %85 = vector.broadcast %83 : vector<1x16xf32> to vector<3x16xf32>
    %86 = arith.mulf %84, %85 : vector<3x16xf32>
    %87 = arith.addf %81, %86 : vector<3x16xf32>
    %88 = vector.extract_strided_slice %8 {offsets = [0, 2], sizes = [3, 1], strides = [1, 1]} : vector<3x3xf32> to vector<3x1xf32>
    %89 = vector.extract_strided_slice %13 {offsets = [2, 0], sizes = [1, 16], strides = [1, 1]} : vector<3x16xf32> to vector<1x16xf32>
    %90 = vector.broadcast %88 : vector<3x1xf32> to vector<3x16xf32>
    %91 = vector.broadcast %89 : vector<1x16xf32> to vector<3x16xf32>
    %92 = arith.mulf %90, %91 : vector<3x16xf32>
    %93 = arith.addf %87, %92 : vector<3x16xf32>
    %c0_14 = arith.constant 0 : index
    %c0_15 = arith.constant 0 : index
    %c0_16 = arith.constant 0 : index
    %94 = vector.load %arg4[%c0_14, %c0_15, %c0_16] : memref<2x3x16xf32, #tpu.memory_space<vmem>>, vector<1x3x16xf32>
    %95 = vector.shape_cast %94 : vector<1x3x16xf32> to vector<3x16xf32>
    %96 = vector.shape_cast %93 : vector<3x16xf32> to vector<1x3x16xf32>
    tpu.vector_store %arg4[%c0_14, %c0_15, %c0_16], %96 {strides = array<i32>} : memref<2x3x16xf32, #tpu.memory_space<vmem>>, vector<1x3x16xf32>,
    %c1 = arith.constant 1 : index
    %c0_17 = arith.constant 0 : index
    %c0_18 = arith.constant 0 : index
    %97 = vector.load %arg0[%c1, %c0_17, %c0_18] : memref<2x3x16xf32, #tpu.memory_space<vmem>>, vector<1x3x16xf32>
    %98 = vector.shape_cast %97 : vector<1x3x16xf32> to vector<3x16xf32>
    %c1_19 = arith.constant 1 : index
    %c0_20 = arith.constant 0 : index
    %c0_21 = arith.constant 0 : index
    %99 = vector.load %arg1[%c1_19, %c0_20, %c0_21] : memref<2x3x16xf32, #tpu.memory_space<vmem>>, vector<1x3x16xf32>
    %100 = vector.shape_cast %99 : vector<1x3x16xf32> to vector<3x16xf32>
    %cst_22 = arith.constant dense<0.000000e+00> : vector<3x16xf32>
    %101 = tpu.matmul %98, %10, %cst_22 {dimension_numbers = #tpu.dot_dimension_numbers<[1], [0], [0], [1], [0, 0, 1, 1], [], []>} : vector<3x16xf32>, vector<16x16xf32>, vector<3x16xf32> -> vector<3x16xf32>
    %102 = arith.subf %101, %98 : vector<3x16xf32>
    %103 = vector.extract_strided_slice %102 {offsets = [0, 0], sizes = [1, 16], strides = [1, 1]} : vector<3x16xf32> to vector<1x16xf32>
    %104 = vector.extract_strided_slice %102 {offsets = [0, 0], sizes = [1, 16], strides = [1, 1]} : vector<3x16xf32> to vector<1x16xf32>
    %105 = arith.mulf %103, %104 : vector<1x16xf32>
    %106 = vector.extract_strided_slice %102 {offsets = [1, 0], sizes = [1, 16], strides = [1, 1]} : vector<3x16xf32> to vector<1x16xf32>
    %107 = vector.extract_strided_slice %102 {offsets = [1, 0], sizes = [1, 16], strides = [1, 1]} : vector<3x16xf32> to vector<1x16xf32>
    %108 = arith.mulf %106, %107 : vector<1x16xf32>
    %109 = arith.addf %105, %108 : vector<1x16xf32>
    %110 = vector.extract_strided_slice %102 {offsets = [2, 0], sizes = [1, 16], strides = [1, 1]} : vector<3x16xf32> to vector<1x16xf32>
    %111 = vector.extract_strided_slice %102 {offsets = [2, 0], sizes = [1, 16], strides = [1, 1]} : vector<3x16xf32> to vector<1x16xf32>
    %112 = arith.mulf %110, %111 : vector<1x16xf32>
    %113 = arith.addf %109, %112 : vector<1x16xf32>
    %114 = math.sqrt %113 : vector<1x16xf32>
    %115 = vector.extract_strided_slice %2 {offsets = [0, 0], sizes = [32, 1], strides = [1, 1]} : vector<32x3xf32> to vector<32x1xf32>
    %116 = vector.extract_strided_slice %100 {offsets = [0, 0], sizes = [1, 16], strides = [1, 1]} : vector<3x16xf32> to vector<1x16xf32>
    %117 = vector.broadcast %115 : vector<32x1xf32> to vector<32x16xf32>
    %118 = vector.broadcast %116 : vector<1x16xf32> to vector<32x16xf32>
    %119 = arith.mulf %117, %118 : vector<32x16xf32>
    %120 = vector.extract_strided_slice %2 {offsets = [0, 1], sizes = [32, 1], strides = [1, 1]} : vector<32x3xf32> to vector<32x1xf32>
    %121 = vector.extract_strided_slice %100 {offsets = [1, 0], sizes = [1, 16], strides = [1, 1]} : vector<3x16xf32> to vector<1x16xf32>
    %122 = vector.broadcast %120 : vector<32x1xf32> to vector<32x16xf32>
    %123 = vector.broadcast %121 : vector<1x16xf32> to vector<32x16xf32>
    %124 = arith.mulf %122, %123 : vector<32x16xf32>
    %125 = arith.addf %119, %124 : vector<32x16xf32>
    %126 = vector.extract_strided_slice %2 {offsets = [0, 2], sizes = [32, 1], strides = [1, 1]} : vector<32x3xf32> to vector<32x1xf32>
    %127 = vector.extract_strided_slice %100 {offsets = [2, 0], sizes = [1, 16], strides = [1, 1]} : vector<3x16xf32> to vector<1x16xf32>
    %128 = vector.broadcast %126 : vector<32x1xf32> to vector<32x16xf32>
    %129 = vector.broadcast %127 : vector<1x16xf32> to vector<32x16xf32>
    %130 = arith.mulf %128, %129 : vector<32x16xf32>
    %131 = arith.addf %125, %130 : vector<32x16xf32>
    %132 = vector.broadcast %3 : vector<32x1xf32> to vector<32x16xf32>
    %133 = vector.broadcast %114 : vector<1x16xf32> to vector<32x16xf32>
    %134 = arith.mulf %132, %133 : vector<32x16xf32>
    %135 = arith.addf %131, %134 : vector<32x16xf32>
    %136 = vector.broadcast %4 : vector<32x1xf32> to vector<32x16xf32>
    %137 = arith.addf %135, %136 : vector<32x16xf32>
    %cst_23 = arith.constant 0.000000e+00 : f32
    %138 = vector.broadcast %cst_23 : f32 to vector<32x16xf32>
    %139 = arith.maximumf %137, %138 : vector<32x16xf32>
    %cst_24 = arith.constant dense<0.000000e+00> : vector<32x16xf32>
    %140 = tpu.matmul %1, %139, %cst_24 {dimension_numbers = #tpu.dot_dimension_numbers<[1], [0], [0], [1], [0, 0, 1, 1], [], []>} : vector<32x32xf32>, vector<32x16xf32>, vector<32x16xf32> -> vector<32x16xf32>
    %141 = vector.broadcast %5 : vector<32x1xf32> to vector<32x16xf32>
    %142 = arith.addf %140, %141 : vector<32x16xf32>
    %cst_25 = arith.constant 0.000000e+00 : f32
    %143 = vector.broadcast %cst_25 : f32 to vector<32x16xf32>
    %144 = arith.maximumf %142, %143 : vector<32x16xf32>
    %cst_26 = arith.constant dense<0.000000e+00> : vector<3x16xf32>
    %145 = tpu.matmul %6, %144, %cst_26 {dimension_numbers = #tpu.dot_dimension_numbers<[1], [0], [0], [1], [0, 0, 1, 1], [], []>} : vector<3x32xf32>, vector<32x16xf32>, vector<3x16xf32> -> vector<3x16xf32>
    %146 = vector.extract_strided_slice %145 {offsets = [0, 0], sizes = [1, 16], strides = [1, 1]} : vector<3x16xf32> to vector<1x16xf32>
    %147 = vector.extract_strided_slice %98 {offsets = [0, 0], sizes = [1, 16], strides = [1, 1]} : vector<3x16xf32> to vector<1x16xf32>
    %148 = arith.mulf %146, %147 : vector<1x16xf32>
    %149 = vector.extract_strided_slice %145 {offsets = [1, 0], sizes = [1, 16], strides = [1, 1]} : vector<3x16xf32> to vector<1x16xf32>
    %150 = vector.extract_strided_slice %98 {offsets = [1, 0], sizes = [1, 16], strides = [1, 1]} : vector<3x16xf32> to vector<1x16xf32>
    %151 = arith.mulf %149, %150 : vector<1x16xf32>
    %152 = arith.addf %148, %151 : vector<1x16xf32>
    %153 = vector.extract_strided_slice %145 {offsets = [2, 0], sizes = [1, 16], strides = [1, 1]} : vector<3x16xf32> to vector<1x16xf32>
    %154 = vector.extract_strided_slice %98 {offsets = [2, 0], sizes = [1, 16], strides = [1, 1]} : vector<3x16xf32> to vector<1x16xf32>
    %155 = arith.mulf %153, %154 : vector<1x16xf32>
    %156 = arith.addf %152, %155 : vector<1x16xf32>
    %157 = vector.broadcast %7 : vector<3x1xf32> to vector<3x16xf32>
    %158 = vector.broadcast %156 : vector<1x16xf32> to vector<3x16xf32>
    %159 = arith.mulf %157, %158 : vector<3x16xf32>
    %cst_27 = arith.constant dense<0.000000e+00> : vector<3x16xf32>
    %160 = tpu.matmul %159, %11, %cst_27 {dimension_numbers = #tpu.dot_dimension_numbers<[1], [0], [0], [1], [0, 0, 1, 1], [], []>} : vector<3x16xf32>, vector<16x16xf32>, vector<3x16xf32> -> vector<3x16xf32>
    %161 = vector.extract_strided_slice %8 {offsets = [0, 0], sizes = [3, 1], strides = [1, 1]} : vector<3x3xf32> to vector<3x1xf32>
    %162 = vector.extract_strided_slice %98 {offsets = [0, 0], sizes = [1, 16], strides = [1, 1]} : vector<3x16xf32> to vector<1x16xf32>
    %163 = vector.broadcast %161 : vector<3x1xf32> to vector<3x16xf32>
    %164 = vector.broadcast %162 : vector<1x16xf32> to vector<3x16xf32>
    %165 = arith.mulf %163, %164 : vector<3x16xf32>
    %166 = arith.addf %160, %165 : vector<3x16xf32>
    %167 = vector.extract_strided_slice %8 {offsets = [0, 1], sizes = [3, 1], strides = [1, 1]} : vector<3x3xf32> to vector<3x1xf32>
    %168 = vector.extract_strided_slice %98 {offsets = [1, 0], sizes = [1, 16], strides = [1, 1]} : vector<3x16xf32> to vector<1x16xf32>
    %169 = vector.broadcast %167 : vector<3x1xf32> to vector<3x16xf32>
    %170 = vector.broadcast %168 : vector<1x16xf32> to vector<3x16xf32>
    %171 = arith.mulf %169, %170 : vector<3x16xf32>
    %172 = arith.addf %166, %171 : vector<3x16xf32>
    %173 = vector.extract_strided_slice %8 {offsets = [0, 2], sizes = [3, 1], strides = [1, 1]} : vector<3x3xf32> to vector<3x1xf32>
    %174 = vector.extract_strided_slice %98 {offsets = [2, 0], sizes = [1, 16], strides = [1, 1]} : vector<3x16xf32> to vector<1x16xf32>
    %175 = vector.broadcast %173 : vector<3x1xf32> to vector<3x16xf32>
    %176 = vector.broadcast %174 : vector<1x16xf32> to vector<3x16xf32>
    %177 = arith.mulf %175, %176 : vector<3x16xf32>
    %178 = arith.addf %172, %177 : vector<3x16xf32>
    %c1_28 = arith.constant 1 : index
    %c0_29 = arith.constant 0 : index
    %c0_30 = arith.constant 0 : index
    %179 = vector.load %arg4[%c1_28, %c0_29, %c0_30] : memref<2x3x16xf32, #tpu.memory_space<vmem>>, vector<1x3x16xf32>
    %180 = vector.shape_cast %179 : vector<1x3x16xf32> to vector<3x16xf32>
    %181 = vector.shape_cast %178 : vector<3x16xf32> to vector<1x3x16xf32>
    tpu.vector_store %arg4[%c1_28, %c0_29, %c0_30], %181 {strides = array<i32>} : memref<2x3x16xf32, #tpu.memory_space<vmem>>, vector<1x3x16xf32>,
    return
  }
}

</mosaic_0001>

<bundles_post_ra>
// kernel: xattention_forward.1
= control target key start
LH: loop header
LB: loop body
LE: loop exit
PB: predicated region body
PF: predicated region fallthrough
CT: control target
= control target key end

     0   :  { %v1192_v0 = vmov 0.0|0.0   ;;  %vm1193_vm0 = vmmov 0   ;;  %v1194_v3 = vmov 0.0   ;;  %v1195_v6 = vmov 33   ;;  %s1201_s30 = smov 112   ;;  %s1490_s3 = inlined_call_operand.vmem [shape: f32[16,32], index: 3, kind: input, shape index: {}]   ;;  %s1491_s2 = inlined_call_operand.vmem [shape: f32[35,38], index: 2, kind: input, shape index: {}]   ;;  %s1492_s0 = inlined_call_operand.vmem [shape: f32[2,3,16], index: 0, kind: input, shape index: {}]   ;;  %s1493_s1 = inlined_call_operand.vmem [shape: f32[2,3,16], index: 1, kind: input, shape index: {}]   ;;  %s1494_s4 = inlined_call_operand.vmem [shape: f32[2,3,16], index: 4, kind: output, shape index: {}]  }
   0x1   :  { %1114 = vmatprep.subr.bf16.mxu0 %v1192_v0  ;;  %v1231_v1 = vld [vmem:[%s1490_s3] sm:$0xff]  ;;  %v1236_v2 = vld [vmem:[%s1490_s3 + $0x8] sm:$0xff]  ;;  %1040 = vmatprep.mubr.msk.f32.mxu0 %vm1193_vm0, %v1194_v3  ;;  %v1196_v7 = vmov 32   ;;  %vm26_vm1 = vcmask 130048   ;;  %v1276_v11 = vld [vmem:[%s1491_s2 + $0x18] sm:$0xff]  ;;  %v1197_v12 = vmov 34   ;;  %v136_v16 = vlaneseq }
   0x2   :  { %v1179_v4 = vpack.i.bf16 %v1236_v2, %v1231_v1  ;;  %v1244_v5 = vpack.c.bf16 %v1236_v2, %v1231_v1  ;;  %1165 = vset.pattern.permute.xlu1 %v1195_v6  ;;  %1164 = vset.pattern.permute.xlu0 %v1196_v7  ;;  %v1251_v8 = vld [vmem:[%s1491_s2] sm:$0xff]  ;;  %v1264_v10 = vld [vmem:[%s1491_s2 + $0x8] sm:$0xff]  ;;  %v1284_v13 = vld [vmem:[%s1491_s2 + $0x10] sm:$0xff]  ;;  %v1198_v14 = vmov 35   ;;  %v1199_v15 = vmov 36  }
   0x3   :  { %145 = vperm.xlu1 %1165, %v1251_v8   ;;  %118 = vperm.xlu0 %1164, %v1251_v8   ;;  %v1259_v9 = vld [vmem:[%s1492_s0] sm:$0x7]  ;;  %v137_v17 = vshrl.u32 %v136_v16, 7  ;;  %v989_v20 = vld [vmem:[%s1493_s1 + $0x4] sm:$0x7]  ;;  %vm268_vm2 = vcmask 261120  }
   0x4   :  { %1116 = vmatpush3.bf16.msra.mxu0 %v1244_v5  ;;  %1051 = vmatprep.mubr.msk.f32.mxu1 %vm268_vm2, %v1251_v8  ;;  %v1200_v43 = vmov 37   ;;  %v25_v1 = vld [vmem:[%s1493_s1] sm:$0x7]  ;;  %vm566_vm7 = vcmask 124928  }
   0x5   :  { %1125 = vmatprep.subr.bf16.mxu0 %v1192_v0  ;;  %v1307_v18 = vsub.s32 0, %v137_v17  ;;  %v1309_v19 = vsub.s32 1, %v137_v17  ;;  %v1322_v27 = vsub.s32 2, %v137_v17 }
   0x7   :  { %1041 = vmatmul.mubr.msk.f32.vlgmr.msra.gmra.mrb[0].mxu0 %vm26_vm1, %v1259_v9  ;;  %149 = vperm.xlu1 %1165, %v1264_v10   ;;  %v664_v21 = vrot.slane %v989_v20, %v1307_v18  ;;  %v672_v22 = vrot.slane %v989_v20, %v1309_v19  ;;  %v684_v33 = vrot.slane %v989_v20, %v1322_v27 }
   0x8   :  { %123 = vperm.xlu0 %1164, %v1264_v10   ;;  %1065 = vmatprep.mubr.msk.f32.mxu0 %vm1193_vm0, %v1194_v3  ;;  %v191_v20 = vrot.slane %v25_v1, %v1322_v27 }
   0xb   :  { %1166 = vset.pattern.permute.xlu1 %v1197_v12 }
   0xc   :  { %177 = vperm.xlu1 %1166, %v1264_v10   ;;  %133 = vperm.xlu0 %1164, %v1276_v11  }
  0x10   :  { %1167 = vset.pattern.permute.xlu1 %v1196_v7  ;;  %1169 = vset.pattern.permute.xlu0 %v1198_v14 }
  0x11   :  { %128 = vperm.xlu1 %1167, %v1284_v13   ;;  %201 = vperm.xlu0 %1169, %v1251_v8  }
  0x15   :  { %1168 = vset.pattern.permute.xlu1 %v1195_v6  ;;  %1170 = vset.pattern.permute.xlu0 %v1197_v12 }
  0x16   :  { %153 = vperm.xlu1 %1168, %v1284_v13   ;;  %173 = vperm.xlu0 %1170, %v1251_v8  }
  0x1a   :  { %157 = vperm.xlu1 %1168, %v1276_v11   ;;  %185 = vperm.xlu0 %1170, %v1276_v11  }
  0x1e   :  { %1171 = vset.pattern.permute.xlu1 %v1198_v14  ;;  %1174 = vset.pattern.permute.xlu0 %v1199_v15 }
  0x1f   :  { %205 = vperm.xlu1 %1171, %v1264_v10   ;;  %229 = vperm.xlu0 %1174, %v1251_v8  }
  0x23   :  { %1172 = vset.pattern.permute.xlu1 %v1197_v12  ;;  %241 = vperm.xlu0 %1174, %v1276_v11  }
  0x24   :  { %181 = vperm.xlu1 %1172, %v1284_v13  }
  0x27   :  { %1177 = vset.pattern.permute.xlu0 %v1200_v43 }
  0x28   :  { %1173 = vset.pattern.permute.xlu1 %v1198_v14  ;;  %257 = vperm.xlu0 %1177, %v1264_v10  }
  0x29   :  { %209 = vperm.xlu1 %1173, %v1284_v13  }
  0x2c   :  { %1178 = vset.pattern.permute.xlu0 %v1196_v7 }
  0x2d   :  { %213 = vperm.xlu1 %1173, %v1276_v11  }
  0x31   :  { %1175 = vset.pattern.permute.xlu1 %v1199_v15 }
  0x32   :  { %233 = vperm.xlu1 %1175, %v1264_v10  }
  0x36   :  { %237 = vperm.xlu1 %1175, %v1284_v13  }
  0x3a   :  { %1176 = vset.pattern.permute.xlu1 %v1200_v43 }
  0x3b   :  { %253 = vperm.xlu1 %1176, %v1251_v8  }
  0x3f   :  { %261 = vperm.xlu1 %1176, %v1284_v13  }
  0x43   :  { %265 = vperm.xlu1 %1176, %v1276_v11  }
  0x47   :  { %1180 = vrot.lane.b32.xlu1 %v1179_v4, %s1201_s30  ;;  %v139_v4 = vrot.slane %v25_v1, %v1307_v18 }
  0x48   :  { %1184 = vset.pattern.permute.xlu1 %v1195_v6  ;;  %v163_v6 = vrot.slane %v25_v1, %v1309_v19 }
  0x82   :  { %v1316_v23 = vpop.permute.xlu0 %118  ;;  %v1318_v24 = vpop.permute.xlu1 %145 }
  0x83   :  { %v665_v25 = vmul.f32 %v664_v21, %v1316_v23  ;;  %v673_v26 = vmul.f32 %v672_v22, %v1318_v24 }
  0x85   :  { %v677_v28 = vadd.f32 %v673_v26, %v665_v25 }
  0x86   :  { %v150_v29 = vpop.permute.xlu1 %149 }
  0x87   :  { %v124_v30 = vpop.permute.xlu0 %123  ;;  %v674_v31 = vmul.f32 %v672_v22, %v150_v29  ;;  %v165_v26 = vmul.f32 %v163_v6, %v150_v29 }
  0x88   :  { %v666_v32 = vmul.f32 %v664_v21, %v124_v30  ;;  %v141_v25 = vmul.f32 %v139_v4, %v124_v30 }
  0x8a   :  { %v678_v34 = vadd.f32 %v674_v31, %v666_v32 }
  0x8b   :  { %v134_v35 = vpop.permute.xlu0 %133  ;;  %v178_v36 = vpop.permute.xlu1 %177 }
  0x8c   :  { %v668_v37 = vmul.f32 %v664_v21, %v134_v35  ;;  %v686_v38 = vmul.f32 %v684_v33, %v178_v36  ;;  %v193_v43 = vmul.f32 %v191_v20, %v178_v36 }
  0x8e   :  { %v1327_v39 = vadd.f32 %v686_v38, %v678_v34 }
  0x90   :  { %v1329_v40 = vpop.permute.xlu0 %201  ;;  %v129_v41 = vpop.permute.xlu1 %128 }
  0x91   :  { %v667_v42 = vmul.f32 %v664_v21, %v129_v41  ;;  %v140_v21 = vmul.f32 %v139_v4, %v1316_v23  ;;  %v142_v31 = vmul.f32 %v139_v4, %v129_v41 }
  0x95   :  { %v174_v44 = vpop.permute.xlu0 %173  ;;  %v154_v45 = vpop.permute.xlu1 %153 }
  0x96   :  { %v685_v46 = vmul.f32 %v684_v33, %v174_v44  ;;  %v675_v47 = vmul.f32 %v672_v22, %v154_v45  ;;  %v166_v32 = vmul.f32 %v163_v6, %v154_v45 }
  0x98   :  { %v1335_v48 = vadd.f32 %v685_v46, %v677_v28  ;;  %v679_v49 = vadd.f32 %v675_v47, %v667_v42  ;;  %v169_v42 = vadd.f32 %v165_v26, %v141_v25  ;;  %v192_v46 = vmul.f32 %v191_v20, %v174_v44 }
  0x99   :  { %v158_v50 = vpop.permute.xlu1 %157  ;;  %v186_v51 = vpop.permute.xlu0 %185  ;;  %v170_v47 = vadd.f32 %v166_v32, %v142_v31  ;;  %v1392_v32 = vld [vmem:[%s1492_s0 + $0x4] sm:$0x7] }
  0x9a   :  { %v676_v52 = vmul.f32 %v672_v22, %v158_v50  ;;  %v688_v53 = vmul.f32 %v684_v33, %v186_v51  ;;  %v164_v22 = vmul.f32 %v163_v6, %v1318_v24  ;;  %v167_v34 = vmul.f32 %v163_v6, %v158_v50 }
  0x9b   :  { %v197_v50 = vadd.f32 %v193_v43, %v169_v42 }
  0x9c   :  { %v680_v54 = vadd.f32 %v676_v52, %v668_v37  ;;  %v168_v38 = vadd.f32 %v164_v22, %v140_v21 }
  0x9e   :  { %v1338_v55 = vpop.permute.xlu1 %205  ;;  %v1340_v56 = vadd.f32 %v688_v53, %v680_v54  ;;  %v1363_v29 = vpop.permute.xlu0 %229  ;;  %v196_v54 = vadd.f32 %v192_v46, %v168_v38 }
  0xa3   :  { %v182_v57 = vpop.permute.xlu1 %181 }
  0xa4   :  { %v687_v58 = vmul.f32 %v684_v33, %v182_v57  ;;  %v143_v33 = vmul.f32 %v139_v4, %v134_v35  ;;  %v194_v23 = vmul.f32 %v191_v20, %v182_v57 }
  0xa6   :  { %v1346_v59 = vadd.f32 %v687_v58, %v679_v49  ;;  %v195_v49 = vmul.f32 %v191_v20, %v186_v51  ;;  %v171_v53 = vadd.f32 %v167_v34, %v143_v33  ;;  %v198_v36 = vadd.f32 %v194_v23, %v170_v47 }
  0xa8   :  { %v1352_v2 = vpop.permute.xlu1 %209  ;;  %v199_v44 = vadd.f32 %v195_v49, %v171_v53 }
  0xac   :  { %v1359_v28 = vpop.permute.xlu1 %213 }
  0xb1   :  { %v1361_v30 = vpop.permute.xlu1 %233 }
  0xda   :  { %v96_v60 = vpop.f32.mrb[0].mxu0 }
  0xdb   :  { %v100_v61 = vsub.f32 %v96_v60, %v1259_v9  ;;  %v1042_v62 = vpop.f32.mrb[1].mxu0 }
  0xdc   :  { %v1372_v62 = vpop.permute.xlu0 %241 }
  0xdd   :  { %v101_v63 = vmul.f32 %v100_v61, %v100_v61  ;;  %v1370_v61 = vpop.permute.xlu1 %237 }
  0xdf   :  { %v103_v7 = vrot.slane %v101_v63, 1  ;;  %v106_v16 = vrot.slane %v101_v63, 2 }
  0xe1   :  { %v105_v15 = vadd.f32 %v103_v7, %v101_v63  ;;  %v1410_v33 = vpop.permute.xlu1 %253 }
  0xe3   :  { %v108_v17 = vadd.f32 %v106_v16, %v105_v15 }
  0xe5   :  { %1188 = vrsqrt.f32 %v108_v17  ;;  %vm111_vm3 = vcmp.eq.f32.partialorder %v108_v17, inf  ;;  %v114_v24 = vand.u32 2147483648, %v108_v17  ;;  %vm113_vm4 = vcmp.eq.f32.partialorder %v108_v17, 0.0  ;;  %v1412_v34 = vpop.permute.xlu1 %261 }
  0xe9   :  { %v1416_v42 = vpop.permute.xlu1 %265 }
  0xed   :  { %v1181_v23 = vpop.permute.xlu1 %1180 }
  0xef   :  { %v1189_v37 = vpop.eup %1188 }
  0xf0   :  { %v110_v52 = vmul.f32 %v1189_v37, %v108_v17  ;;  %v1414_v37 = vpop.permute.xlu0 %257 }
  0xf2   :  { %v112_v41 = vsel %vm111_vm3, %v108_v17, %v110_v52 }
  0xf3   :  { %v115_v35 = vsel %vm113_vm4, %v114_v24, %v112_v41 }
  0xf4   :  { %v219_v45 = vrot.slane %v115_v35, %v1307_v18 }
  0xf6   :  { %v222_v51 = vmul.f32 %v219_v45, %v1352_v2  ;;  %v223_v58 = vmul.f32 %v219_v45, %v1359_v28  ;;  %v221_v57 = vmul.f32 %v219_v45, %v1338_v55  ;;  %v220_v60 = vmul.f32 %v219_v45, %v1329_v40 }
  0xf8   :  { %v225_v63 = vadd.f32 %v221_v57, %v197_v50  ;;  %v224_v7 = vadd.f32 %v220_v60, %v196_v54  ;;  %v226_v15 = vadd.f32 %v222_v51, %v198_v36  ;;  %v227_v16 = vadd.f32 %v223_v58, %v199_v44 }
  0xf9   :  { %v1183_v54 = vunpack.i.h.bf16 %v1181_v23  ;;  %v1182_v36 = vunpack.i.l.bf16 %v1181_v23 }
  0xfa   :  { %v245_v17 = vadd.f32 %v1361_v30, %v225_v63  ;;  %v244_v1 = vadd.f32 %v1363_v29, %v224_v7  ;;  %v246_v4 = vadd.f32 %v1370_v61, %v226_v15  ;;  %v247_v6 = vadd.f32 %v1372_v62, %v227_v16 }
  0xfb   :  { %v1424_v60 = vpack.c.bf16 %v1183_v54, %v1182_v36  ;;  %v563_v36 = vrot.slane %v1259_v9, %v1322_v27 }
  0xfc   :  { %v249_v20 = vmax.f32 %v245_v17, 0.0  ;;  %v248_v21 = vmax.f32 %v244_v1, 0.0  ;;  %v250_v22 = vmax.f32 %v246_v4, 0.0  ;;  %v251_v25 = vmax.f32 %v247_v6, 0.0 }
  0xfe   :  { %v1117_v26 = vpack.c.bf16 %v249_v20, %v248_v21  ;;  %v1121_v31 = vpack.c.bf16 %v251_v25, %v250_v22 }
 0x100   :  { %1118 = vmatprep.subr.bf16.mxu1 %v1117_v26 }
 0x101   :  { %1120 = vmatpush3.bf16.msra.mxu1 %v1117_v26 }
 0x102   :  { %1122 = vmatprep.subr.bf16.mxu1 %v1121_v31 }
 0x105   :  { %1124 = vmatpush3.bf16.msra.mxu1 %v1121_v31 }
 0x106   :  { %1134 = vmatprep.subr.bf16.mxu1 %v1192_v0 }
 0x108   :  { %1052 = vmatmul.mubr.msk.f32.vlgmr.msra.gmra.mrb[0].mxu1 %vm268_vm2, %v1264_v10 }
 0x109   :  { %1054 = vmatprep.mubr.msk.f32.mxu1 %vm268_vm2, %v1284_v13  ;;  %1136 = vmatpush3.bf16.msra.mxu1 %v1244_v5  ;;  %v1401_v5 = vld [vmem:[%s1491_s2 + $0x20] sm:$0x7] }
 0x10a   :  { %1145 = vmatprep.subr.bf16.mxu1 %v1192_v0  ;;  %448 = vperm.xlu0 %1178, %v1401_v5  }
 0x10b   :  { %457 = vperm.xlu1 %1184, %v1401_v5  }
 0x10c   :  { %1055 = vmatmul.mubr.msk.f32.gmra.mrb[2].mxu1 %vm268_vm2, %v1276_v11 }
 0x10d   :  { %1079 = vmatprep.mubr.msk.f32.mxu1 %vm1193_vm0, %v1194_v3 }
 0x10e   :  { %1185 = vset.pattern.permute.xlu0 %v1197_v12 }
 0x10f   :  { %1186 = vset.pattern.permute.xlu1 %v1198_v14  ;;  %547 = vperm.xlu0 %1185, %v1401_v5  }
 0x110   :  { %1080 = vmatmul.mubr.msk.f32.vlgmr.msra.gmra.mrb[4].mxu1 %vm26_vm1, %v1392_v32  ;;  %557 = vperm.xlu1 %1186, %v1401_v5  }
 0x111   :  { %1104 = vmatprep.mubr.msk.f32.mxu1 %vm1193_vm0, %v1194_v3 }
 0x113   :  { %1187 = vset.pattern.permute.xlu0 %v1198_v14 }
 0x1db   :  { %v1053_v38 = vpop.f32.mrb[0].mxu1 }
 0x1dc   :  { %v349_v43 = vadd.f32 %v1053_v38, %v1414_v37  ;;  %v343_v12 = vpop.f32.mrb[1].mxu1 }
 0x1dd   :  { %v344_v46 = vadd.f32 %v343_v12, %v1410_v33 }
 0x1de   :  { %v363_v47 = vmax.f32 %v349_v43, 0.0 }
 0x1df   :  { %v362_v49 = vmax.f32 %v344_v46, 0.0  ;;  %v1056_v52 = vpop.f32.mrb[2].mxu1 }
 0x1e0   :  { %v359_v53 = vadd.f32 %v1056_v52, %v1416_v42  ;;  %v353_v14 = vpop.f32.mrb[3].mxu1 }
 0x1e1   :  { %v1126_v24 = vpack.c.bf16 %v363_v47, %v362_v49  ;;  %v354_v41 = vadd.f32 %v353_v14, %v1412_v34 }
 0x1e2   :  { %v365_v35 = vmax.f32 %v359_v53, 0.0 }
 0x1e3   :  { %v364_v45 = vmax.f32 %v354_v41, 0.0  ;;  %1127 = vmatpush3.bf16.msra.mxu0 %v1126_v24  ;;  %v641_v50 = vpop.f32.mrb[4].mxu1 }
 0x1e4   :  { %v645_v44 = vsub.f32 %v641_v50, %v1392_v32  ;;  %1128 = vmatprep.subr.bf16.mxu0 %v1192_v0  ;;  %v1081_v51 = vpop.f32.mrb[5].mxu1  ;;  %v553_v50 = vrot.slane %v1259_v9, %v1309_v19 }
 0x1e5   :  { %v1129_v58 = vpack.c.bf16 %v365_v35, %v364_v45  ;;  %v463_v45 = vrot.slane %v1259_v9, %v1307_v18 }
 0x1e6   :  { %v646_v57 = vmul.f32 %v645_v44, %v645_v44 }
 0x1e7   :  { %1130 = vmatpush3.bf16.msra.mxu0 %v1129_v58 }
 0x1e8   :  { %v648_v63 = vrot.slane %v646_v57, 1  ;;  %v651_v7 = vrot.slane %v646_v57, 2  ;;  %1131 = vmatprep.subr.bf16.mxu0 %v1192_v0 }
 0x1ea   :  { %v650_v15 = vadd.f32 %v648_v63, %v646_v57  ;;  %1066 = vmatmul.mubr.msk.f32.vlgmr.msra.gmra.mrb[2].mxu0 %vm268_vm2, %v1401_v5 }
 0x1eb   :  { %1133 = vmatpush3.bf16.msra.mxu0 %v1424_v60  ;;  %1072 = vmatprep.mubr.msk.f32.mxu0 %vm1193_vm0, %v1194_v3 }
 0x1ec   :  { %v653_v16 = vadd.f32 %v651_v7, %v650_v15 }
 0x1ee   :  { %1190 = vrsqrt.f32 %v653_v16  ;;  %vm656_vm5 = vcmp.eq.f32.partialorder %v653_v16, inf  ;;  %v659_v1 = vand.u32 2147483648, %v653_v16  ;;  %vm658_vm6 = vcmp.eq.f32.partialorder %v653_v16, 0.0 }
 0x1f8   :  { %v1191_v17 = vpop.eup %1190 }
 0x1f9   :  { %v655_v4 = vmul.f32 %v1191_v17, %v653_v16 }
 0x1fb   :  { %v657_v6 = vsel %vm656_vm5, %v653_v16, %v655_v4 }
 0x1fc   :  { %v660_v20 = vsel %vm658_vm6, %v659_v1, %v657_v6 }
 0x1fd   :  { %v696_v21 = vrot.slane %v660_v20, %v1307_v18 }
 0x1ff   :  { %v697_v22 = vmul.f32 %v696_v21, %v1329_v40  ;;  %v698_v25 = vmul.f32 %v696_v21, %v1338_v55  ;;  %v699_v26 = vmul.f32 %v696_v21, %v1352_v2  ;;  %v700_v31 = vmul.f32 %v696_v21, %v1359_v28 }
 0x201   :  { %v701_v38 = vadd.f32 %v697_v22, %v1335_v48  ;;  %v702_v43 = vadd.f32 %v698_v25, %v1327_v39  ;;  %v703_v12 = vadd.f32 %v699_v26, %v1346_v59  ;;  %v704_v46 = vadd.f32 %v700_v31, %v1340_v56 }
 0x203   :  { %v705_v47 = vadd.f32 %v701_v38, %v1363_v29  ;;  %v706_v49 = vadd.f32 %v702_v43, %v1361_v30  ;;  %v707_v40 = vadd.f32 %v703_v12, %v1370_v61  ;;  %v708_v55 = vadd.f32 %v704_v46, %v1372_v62  ;;  %v449_v30 = vpop.permute.xlu0 %448  ;;  %v458_v62 = vpop.permute.xlu1 %457 }
 0x205   :  { %v709_v52 = vmax.f32 %v705_v47, 0.0  ;;  %v710_v2 = vmax.f32 %v706_v49, 0.0  ;;  %v711_v53 = vmax.f32 %v707_v40, 0.0  ;;  %v712_v28 = vmax.f32 %v708_v55, 0.0 }
 0x207   :  { %v1137_v14 = vpack.c.bf16 %v710_v2, %v709_v52  ;;  %v1141_v48 = vpack.c.bf16 %v712_v28, %v711_v53  ;;  %v548_v54 = vpop.permute.xlu0 %547  ;;  %v558_v44 = vpop.permute.xlu1 %557 }
 0x208   :  { %v564_v57 = vmul.f32 %v563_v36, %v558_v44 }
 0x209   :  { %1138 = vmatprep.subr.bf16.mxu0 %v1137_v14 }
 0x2bd   :  { %v435_v39 = vpop.f32.mrb[2].mxu0 }
 0x2be   :  { %v439_v59 = vmul.f32 %v435_v39, %v1259_v9  ;;  %v1067_v23 = vpop.f32.mrb[3].mxu0 }
 0x2c0   :  { %v441_v56 = vrot.slane %v439_v59, 1  ;;  %v444_v29 = vrot.slane %v439_v59, 2 }
 0x2c2   :  { %v443_v24 = vadd.f32 %v441_v56, %v439_v59 }
 0x2c4   :  { %v446_v41 = vadd.f32 %v444_v29, %v443_v24 }
 0x2c6   :  { %v454_v61 = vrot.slane %v446_v41, %v1307_v18 }
 0x2c8   :  { %v455_v35 = vmul.f32 %v454_v61, %v449_v30 }
 0x2ca   :  { %1073 = vmatmul.mubr.msk.f32.vlgmr.msra.gmra.mrb[4].mxu0 %vm26_vm1, %v455_v35 }
 0x2cb   :  { %1140 = vmatpush3.bf16.msra.mxu0 %v1137_v14  ;;  %1090 = vmatprep.mubr.msk.f32.mxu0 %vm268_vm2, %v1251_v8  ;;  %v464_v8 = vmul.f32 %v463_v45, %v458_v62 }
 0x2cc   :  { %1142 = vmatprep.subr.bf16.mxu0 %v1141_v48 }
 0x2cf   :  { %1144 = vmatpush3.bf16.msra.mxu0 %v1141_v48 }
 0x2d2   :  { %1091 = vmatmul.mubr.msk.f32.vlgmr.msra.gmra.mrb[6].mxu0 %vm268_vm2, %v1264_v10  ;;  %v554_v10 = vmul.f32 %v553_v50, %v548_v54 }
 0x2d3   :  { %1093 = vmatprep.mubr.msk.f32.mxu0 %vm268_vm2, %v1284_v13 }
 0x2d6   :  { %1094 = vmatmul.mubr.msk.f32.gmra.mrb[8].mxu0 %vm268_vm2, %v1276_v11 }
 0x39d   :  { %v542_v51 = vpop.f32.mrb[4].mxu0 }
 0x39e   :  { %v543_v58 = vadd.f32 %v542_v51, %v464_v8  ;;  %v1074_v13 = vpop.f32.mrb[5].mxu0 }
 0x3a0   :  { %v555_v63 = vadd.f32 %v554_v10, %v543_v58 }
 0x3a2   :  { %v565_v11 = vadd.f32 %v564_v57, %v555_v63 }
 0x3a4   :  { %567 = vst.msk [vmem:[%s1494_s4] sm:$0x7] %vm566_vm7, %v565_v11 }
 0x3a5   :  { %v1092_v7 = vpop.f32.mrb[6].mxu0 }
 0x3a6   :  { %v785_v15 = vadd.f32 %v1092_v7, %v1414_v37  ;;  %v779_v16 = vpop.f32.mrb[7].mxu0 }
 0x3a7   :  { %v780_v9 = vadd.f32 %v779_v16, %v1410_v33 }
 0x3a8   :  { %v799_v17 = vmax.f32 %v785_v15, 0.0 }
 0x3a9   :  { %v798_v1 = vmax.f32 %v780_v9, 0.0  ;;  %v1095_v4 = vpop.f32.mrb[8].mxu0 }
 0x3aa   :  { %v795_v6 = vadd.f32 %v1095_v4, %v1416_v42  ;;  %v789_v20 = vpop.f32.mrb[9].mxu0 }
 0x3ab   :  { %v1146_v21 = vpack.c.bf16 %v799_v17, %v798_v1  ;;  %v790_v22 = vadd.f32 %v789_v20, %v1412_v34 }
 0x3ac   :  { %v801_v25 = vmax.f32 %v795_v6, 0.0 }
 0x3ad   :  { %v800_v26 = vmax.f32 %v790_v22, 0.0  ;;  %1147 = vmatpush3.bf16.msra.mxu1 %v1146_v21 }
 0x3ae   :  { %1148 = vmatprep.subr.bf16.mxu1 %v1192_v0 }
 0x3af   :  { %v1149_v31 = vpack.c.bf16 %v801_v25, %v800_v26 }
 0x3b1   :  { %1150 = vmatpush3.bf16.msra.mxu1 %v1149_v31 }
 0x3b2   :  { %1151 = vmatprep.subr.bf16.mxu1 %v1192_v0  ;;  %v888_v0 = vrot.slane %v1392_v32, %v1307_v18 }
 0x3b4   :  { %1105 = vmatmul.mubr.msk.f32.vlgmr.msra.gmra.mrb[6].mxu1 %vm268_vm2, %v1401_v5  ;;  %v966_v5 = vrot.slane %v1392_v32, %v1309_v19 }
 0x3b5   :  { %1153 = vmatpush3.bf16.msra.mxu1 %v1424_v60  ;;  %1111 = vmatprep.mubr.msk.f32.mxu1 %vm1193_vm0, %v1194_v3  ;;  %v889_v3 = vmul.f32 %v888_v0, %v458_v62  ;;  %v972_v60 = vrot.slane %v1392_v32, %v1322_v27 }
 0x3b6   :  { %v967_v49 = vmul.f32 %v966_v5, %v548_v54 }
 0x3b7   :  { %v973_v55 = vmul.f32 %v972_v60, %v558_v44 }
 0x487   :  { %v868_v33 = vpop.f32.mrb[6].mxu1 }
 0x488   :  { %v872_v34 = vmul.f32 %v1392_v32, %v868_v33  ;;  %v1106_v37 = vpop.f32.mrb[7].mxu1 }
 0x48a   :  { %v874_v42 = vrot.slane %v872_v34, 1  ;;  %v877_v43 = vrot.slane %v872_v34, 2 }
 0x48c   :  { %v876_v38 = vadd.f32 %v874_v42, %v872_v34 }
 0x48e   :  { %v879_v12 = vadd.f32 %v877_v43, %v876_v38 }
 0x490   :  { %v883_v46 = vrot.slane %v879_v12, %v1307_v18 }
 0x492   :  { %v884_v47 = vmul.f32 %v883_v46, %v449_v30 }
 0x494   :  { %1112 = vmatmul.mubr.msk.f32.vlgmr.msra.gmra.mrb[8].mxu1 %vm26_vm1, %v884_v47 }
 0x567   :  { %v959_v40 = vpop.f32.mrb[8].mxu1 }
 0x568   :  { %v960_v52 = vadd.f32 %v959_v40, %v889_v3  ;;  %v1113_v2 = vpop.f32.mrb[9].mxu1 }
 0x56a   :  { %v968_v53 = vadd.f32 %v967_v49, %v960_v52 }
 0x56c   :  { %v974_v28 = vadd.f32 %v973_v55, %v968_v53 }
 0x56e   :  { %997 = vst.msk [vmem:[%s1494_s4 + $0x4] sm:$0x7] %vm566_vm7, %v974_v28 }

</bundles_post_ra>
